<compile_context>
chip_gen: v7x
topology: tpu7x:2x2x1
jax: 0.10.0
libtpu: 0.0.40
codegen_flags: <defaults>
</compile_context>

<pallas_src>
import functools

import jax
import jax.numpy as jnp
from jax.experimental import pallas as pl
from jax.experimental.pallas import tpu as pltpu


def attention_kernel(h_ref, w1_ref, b1_ref, w2_ref, o_ref, *, bf16_weighted_sum):
    # h_ref:  (BB, T, H) bf16   -- block of BB batch rows (the streamed operand)
    # w1_ref: (H, A)     bf16   -- W1 transposed (MXU-native dtype)
    # b1_ref: (1, A)     f32
    # w2_ref: (1, A)     f32    -- W2 as a row (b2 folded away, see header)
    # o_ref:  (BB, H)    f32
    BB, T, H = h_ref.shape
    A = w1_ref.shape[1]

    hb = h_ref[...]                                    # (BB, T, H) bf16, single read
    w1 = w1_ref[...]
    b1 = b1_ref[...]
    w2 = w2_ref[...]

    # ---- attention scores: one big MXU matmul (M = BB*T) --------------------
    # Reshape is layout-free when T % 8 == 0 (same (8,128) tiling of the
    # trailing dims); for other T Mosaic inserts a relayout.
    h2 = hb.reshape(BB * T, H)                         # (BB*T, H) bf16
    z = jnp.tanh(
        jnp.dot(h2, w1, preferred_element_type=jnp.float32) + b1
    )                                                  # (BB*T, A) f32
    z3 = z.reshape(BB, T, A)                           # (BB, T, A) f32, free when T%8==0

    # W2 has a single output unit: a width-1 MXU matmul wastes 127/128 output
    # columns, so use a VPU multiply + lane reduce instead.
    a3 = jnp.sum(z3 * w2, axis=-1, keepdims=True)      # (BB, T, 1) f32

    # ---- softmax over the time axis (sublane axis), tiny data ---------------
    m = jnp.max(a3, axis=1, keepdims=True)             # (BB, 1, 1)
    e = jnp.exp(a3 - m)                                # (BB, T, 1)
    denom = jnp.sum(e, axis=1, keepdims=True)          # (BB, 1, 1)
    alpha = e * pl.reciprocal(denom, approx=True)      # (BB, T, 1) f32

    # ---- weighted sum over time: out[b, :] = sum_t alpha[b, t] * h[b, t, :] -
    if bf16_weighted_sum:
        # v6e/v7x: bf16-native VALU -> do the big multiply in bf16, accumulate f32.
        out = jnp.sum(hb * alpha.astype(hb.dtype), axis=1, dtype=jnp.float32)
    else:
        # v5e / unknown: no bf16 VALU -> keep the elementwise math in f32.
        out = jnp.sum(hb.astype(jnp.float32) * alpha, axis=1)
    o_ref[...] = out.astype(o_ref.dtype)               # (BB, H)


def _round_up(x, m):
    return ((x + m - 1) // m) * m


def _chip_config():
    """Generation-aware block-size / VMEM-limit / dtype decisions."""
    kind = ""
    try:
        kind = jax.devices()[0].device_kind.lower()
    except Exception:
        pass
    if ("v5 lite" in kind) or ("v5e" in kind) or ("v5lite" in kind):
        # 128 MiB VMEM, ~820 GB/s HBM, no bf16 VPU/EUP, 1 TensorCore.
        return dict(block_bytes=8 << 20, vmem_limit=96 << 20, two_tc=False, bf16_vpu=False)
    if "v6" in kind:
        # 128 MiB VMEM, ~1.4 TB/s HBM, bf16 VPU, 1 TensorCore.
        return dict(block_bytes=8 << 20, vmem_limit=96 << 20, two_tc=False, bf16_vpu=True)
    if ("v7" in kind) or ("7x" in kind):
        # 64 MiB VMEM per TC, ~3.2 TB/s HBM, bf16 VPU, 2 TensorCores.
        return dict(block_bytes=4 << 20, vmem_limit=48 << 20, two_tc=True, bf16_vpu=True)
    # Unknown chip: conservative settings (known-good on the test sandbox).
    return dict(block_bytes=2 << 20, vmem_limit=32 << 20, two_tc=False, bf16_vpu=False)


def attention_forward(h, w1, b1, w2, b2=None, *, block_b=None):
    """h: (B, T, H).  w1: (A, H), b1: (A,), w2: (1, A), b2: (1,)
    (PyTorch nn.Linear layout).  Returns (B, H) float32.

    b2 is accepted for API parity but unused: softmax shift-invariance makes a
    constant score bias an exact no-op."""
    B, T, H = h.shape
    A = w1.shape[0]
    del b2

    cfg = _chip_config()

    # h is the only large operand: keep it bf16 in HBM to halve DMA traffic.
    h_bf = jnp.asarray(h, jnp.bfloat16)
    w1_t = jnp.asarray(w1, jnp.bfloat16).T             # (H, A)
    b1_r = jnp.asarray(b1, jnp.float32).reshape(1, A)
    w2_r = jnp.asarray(w2, jnp.float32).reshape(1, A)

    # --- block sizing: bf16 byte accounting, multi-MiB blocks ---------------
    row_bytes = T * H * 2                               # bf16 bytes streamed per batch row
    if block_b is None:
        block_b = cfg["block_bytes"] // max(1, row_bytes)
        if cfg["two_tc"] and B >= 16:
            # Only split the batch across grid steps when there are 2 TCs to feed.
            block_b = min(block_b, (B + 1) // 2)
    block_b = int(max(8, min(block_b, 4096)))
    block_b = _round_up(block_b, 8)                     # 8-aligned sublane stores
    block_b = min(block_b, _round_up(B, 8))             # never bigger than padded batch

    num_blocks = -(-B // block_b)
    if cfg["two_tc"] and num_blocks > 1 and num_blocks % 2 == 1:
        num_blocks += 1                                 # even step count across 2 TCs
    Bp = num_blocks * block_b

    # Pad batch (padded rows are zeros -> softmax is uniform, weighted sum of
    # zeros is zero -> no NaNs; rows are sliced off below).
    if Bp != B:
        h_bf = jnp.pad(h_bf, ((0, Bp - B), (0, 0), (0, 0)))

    kernel = functools.partial(attention_kernel, bf16_weighted_sum=cfg["bf16_vpu"])

    out = pl.pallas_call(
        kernel,
        out_shape=jax.ShapeDtypeStruct((Bp, H), jnp.float32),
        grid_spec=pltpu.PrefetchScalarGridSpec(
            num_scalar_prefetch=0,
            grid=(num_blocks,),
            in_specs=[
                pl.BlockSpec((block_b, T, H), lambda i: (i, 0, 0)),  # h block
                pl.BlockSpec((H, A), lambda i: (0, 0)),              # W1^T
                pl.BlockSpec((1, A), lambda i: (0, 0)),              # b1
                pl.BlockSpec((1, A), lambda i: (0, 0)),              # W2 row
            ],
            out_specs=pl.BlockSpec((block_b, H), lambda i: (i, 0)),
        ),
        compiler_params=pltpu.CompilerParams(
            dimension_semantics=("parallel",),
            vmem_limit_bytes=cfg["vmem_limit"],
        ),
    )(h_bf, w1_t, b1_r, w2_r)

    return out[:B]
    # TODO(synk): for production H < 128 the output (and every h vreg) wastes
    # (128-H)/128 of each lane; a wrapper-side lane-dense re-layout (folding T
    # or batch into the trailing dim) would remove masked partial stores.


def _reference(h, w1, b1, w2, b2):
    # Pure-JAX reference mirroring the PyTorch forward exactly (f32).
    z = jnp.tanh(jnp.einsum("bth,ah->bta", h, w1) + b1)       # (B, T, A)
    a = (jnp.einsum("bta,oa->bto", z, w2) + b2)[..., 0]       # (B, T)
    alpha = jax.nn.softmax(a, axis=1)                         # (B, T)
    return jnp.sum(h * alpha[..., None], axis=1)              # (B, H)


if __name__ == "__main__":
    key = jax.random.PRNGKey(0)
    kh, k1, k2, k3, k4 = jax.random.split(key, 5)

    B, T, H, A = 8, 8, 32, 16   # batch, seq, hidden_size, attention_size
    h = jax.random.normal(kh, (B, T, H), dtype=jnp.float32)
    # nn.Linear parameter layout: weight (out, in), bias (out,)
    w1 = jax.random.normal(k1, (A, H), dtype=jnp.float32) * 0.1
    b1 = jax.random.normal(k2, (A,), dtype=jnp.float32) * 0.1
    w2 = jax.random.normal(k3, (1, A), dtype=jnp.float32) * 0.1
    b2 = jax.random.normal(k4, (1,), dtype=jnp.float32) * 0.1

    out = jax.block_until_ready(attention_forward(h, w1, b1, w2, b2))
    ref = _reference(h, w1, b1, w2, b2)
    assert out.shape == (B, H)
    err = float(jnp.max(jnp.abs(out - ref)))
    # bf16 h/W1 + approx reciprocal -> small numeric drift vs the f32 reference.
    assert jnp.allclose(out, ref, atol=3e-2, rtol=3e-2), f"mismatch: {err}"

    # Also exercise the batch-padding path (B not a multiple of the block).
    B2 = 5
    h2 = jax.random.normal(kh, (B2, T, H), dtype=jnp.float32)
    out2 = jax.block_until_ready(attention_forward(h2, w1, b1, w2, b2))
    ref2 = _reference(h2, w1, b1, w2, b2)
    assert out2.shape == (B2, H)
    assert jnp.allclose(out2, ref2, atol=3e-2, rtol=3e-2), "padded-batch mismatch"

    print("KERNEL_OK")
</pallas_src>

<mosaic_0001>
module attributes {stable_mosaic.version = 11 : i64} {
  func.func @attention_kernel(%arg0: i32, %arg1: memref<8x8x32xbf16, #tpu.memory_space<vmem>>, %arg2: memref<32x16xbf16, #tpu.memory_space<vmem>>, %arg3: memref<1x16xf32, #tpu.memory_space<vmem>>, %arg4: memref<1x16xf32, #tpu.memory_space<vmem>>, %arg5: memref<8x32xf32, #tpu.memory_space<vmem>>) attributes {dimension_semantics = [#tpu.dimension_semantics<parallel>], iteration_bounds = array<i64: 1>, scalar_prefetch = 0 : i64, scratch_operands = 0 : i64, tpu.core_type = #tpu.core_type<tc>, window_params = [{transform_indices = @transform_0, window_bounds = array<i64: 8, 8, 32>}, {pipeline_mode = #tpu.pipeline_mode<synchronous>, transform_indices = @transform_1, window_bounds = array<i64: 32, 16>}, {pipeline_mode = #tpu.pipeline_mode<synchronous>, transform_indices = @transform_2, window_bounds = array<i64: 1, 16>}, {pipeline_mode = #tpu.pipeline_mode<synchronous>, transform_indices = @transform_3, window_bounds = array<i64: 1, 16>}, {transform_indices = @transform_4, window_bounds = array<i64: 8, 32>}]} {
    %c0 = arith.constant 0 : index
    %c0_0 = arith.constant 0 : index
    %c0_1 = arith.constant 0 : index
    %0 = vector.load %arg1[%c0, %c0_0, %c0_1] : memref<8x8x32xbf16, #tpu.memory_space<vmem>>, vector<8x8x32xbf16>
    %c0_2 = arith.constant 0 : index
    %c0_3 = arith.constant 0 : index
    %1 = vector.load %arg2[%c0_2, %c0_3] : memref<32x16xbf16, #tpu.memory_space<vmem>>, vector<32x16xbf16>
    %c0_4 = arith.constant 0 : index
    %c0_5 = arith.constant 0 : index
    %2 = vector.load %arg3[%c0_4, %c0_5] : memref<1x16xf32, #tpu.memory_space<vmem>>, vector<1x16xf32>
    %c0_6 = arith.constant 0 : index
    %c0_7 = arith.constant 0 : index
    %3 = vector.load %arg4[%c0_6, %c0_7] : memref<1x16xf32, #tpu.memory_space<vmem>>, vector<1x16xf32>
    %4 = vector.shape_cast %0 : vector<8x8x32xbf16> to vector<64x32xbf16>
    %cst = arith.constant dense<0.000000e+00> : vector<64x16xf32>
    %5 = tpu.matmul %4, %1, %cst {dimension_numbers = #tpu.dot_dimension_numbers<[1], [0], [0], [1], [0, 0, 1, 1], [], []>} : vector<64x32xbf16>, vector<32x16xbf16>, vector<64x16xf32> -> vector<64x16xf32>
    %6 = vector.broadcast %2 : vector<1x16xf32> to vector<64x16xf32>
    %7 = arith.addf %5, %6 : vector<64x16xf32>
    %8 = math.tanh %7 : vector<64x16xf32>
    %9 = vector.shape_cast %8 : vector<64x16xf32> to vector<8x8x16xf32>
    %10 = vector.shape_cast %3 : vector<1x16xf32> to vector<1x1x16xf32>
    %11 = vector.broadcast %10 : vector<1x1x16xf32> to vector<8x8x16xf32>
    %12 = arith.mulf %9, %11 : vector<8x8x16xf32>
    %cst_8 = arith.constant dense<0.000000e+00> : vector<8x8xf32>
    %13 = vector.multi_reduction <add>, %12, %cst_8 [2] : vector<8x8x16xf32> to vector<8x8xf32>
    %14 = vector.shape_cast %13 : vector<8x8xf32> to vector<8x8x1xf32>
    %cst_9 = arith.constant dense<0xFF800000> : vector<8x1xf32>
    %15 = vector.multi_reduction <maximumf>, %14, %cst_9 [1] : vector<8x8x1xf32> to vector<8x1xf32>
    %16 = vector.shape_cast %15 : vector<8x1xf32> to vector<8x1x1xf32>
    %17 = vector.broadcast %16 : vector<8x1x1xf32> to vector<8x8x1xf32>
    %18 = arith.subf %14, %17 : vector<8x8x1xf32>
    %19 = math.exp %18 : vector<8x8x1xf32>
    %cst_10 = arith.constant dense<0.000000e+00> : vector<8x1xf32>
    %20 = vector.multi_reduction <add>, %19, %cst_10 [1] : vector<8x8x1xf32> to vector<8x1xf32>
    %21 = vector.shape_cast %20 : vector<8x1xf32> to vector<8x1x1xf32>
    %22 = tpu.reciprocal %21 {approx = true} : vector<8x1x1xf32> -> vector<8x1x1xf32>
    %23 = vector.broadcast %22 : vector<8x1x1xf32> to vector<8x8x1xf32>
    %24 = arith.mulf %19, %23 : vector<8x8x1xf32>
    %25 = arith.extf %0 : vector<8x8x32xbf16> to vector<8x8x32xf32>
    %26 = vector.broadcast %24 : vector<8x8x1xf32> to vector<8x8x32xf32>
    %27 = arith.mulf %25, %26 : vector<8x8x32xf32>
    %cst_11 = arith.constant dense<0.000000e+00> : vector<8x32xf32>
    %28 = vector.multi_reduction <add>, %27, %cst_11 [1] : vector<8x8x32xf32> to vector<8x32xf32>
    %c0_12 = arith.constant 0 : index
    %c0_13 = arith.constant 0 : index
    %29 = vector.load %arg5[%c0_12, %c0_13] : memref<8x32xf32, #tpu.memory_space<vmem>>, vector<8x32xf32>
    tpu.vector_store %arg5[%c0_12, %c0_13], %28 {strides = array<i32>} : memref<8x32xf32, #tpu.memory_space<vmem>>, vector<8x32xf32>,
    return
  }
  func.func @transform_0(%arg0: i32) -> (i32, i32, i32) {
    %c0_i32 = arith.constant 0 : i32
    %c0_i32_0 = arith.constant 0 : i32
    %c0_i32_1 = arith.constant 0 : i32
    return %arg0, %c0_i32, %c0_i32_0 : i32, i32, i32
  }
  func.func @transform_1(%arg0: i32) -> (i32, i32) {
    %c0_i32 = arith.constant 0 : i32
    %c0_i32_0 = arith.constant 0 : i32
    %c0_i32_1 = arith.constant 0 : i32
    return %c0_i32, %c0_i32_0 : i32, i32
  }
  func.func @transform_2(%arg0: i32) -> (i32, i32) {
    %c0_i32 = arith.constant 0 : i32
    %c0_i32_0 = arith.constant 0 : i32
    %c0_i32_1 = arith.constant 0 : i32
    return %c0_i32, %c0_i32_0 : i32, i32
  }
  func.func @transform_3(%arg0: i32) -> (i32, i32) {
    %c0_i32 = arith.constant 0 : i32
    %c0_i32_0 = arith.constant 0 : i32
    %c0_i32_1 = arith.constant 0 : i32
    return %c0_i32, %c0_i32_0 : i32, i32
  }
  func.func @transform_4(%arg0: i32) -> (i32, i32) {
    %c0_i32 = arith.constant 0 : i32
    %c0_i32_0 = arith.constant 0 : i32
    return %arg0, %c0_i32 : i32, i32
  }
}

</mosaic_0001>

<bundles_post_ra>
// kernel: tpu_custom_call.1
= control target key start
LH: loop header
LB: loop body
LE: loop exit
PB: predicated region body
PF: predicated region fallthrough
CT: control target
= control target key end

     0   :  { %9 = vsyncpa [#allocation3], 0  ;;  %s747_s0 = inlined_call_operand.hbm [shape: bf16[8,8,32], index: 0, kind: input, shape index: {}]   ;;  %s748_s1 = inlined_call_operand.vmem [shape: bf16[32,16], index: 1, kind: input, shape index: {}]   ;;  %s749_s2 = inlined_call_operand.vmem [shape: f32[1,16], index: 2, kind: input, shape index: {}]   ;;  %s750_s3 = inlined_call_operand.vmem [shape: f32[1,16], index: 3, kind: input, shape index: {}]   ;;  %s751_s4 = inlined_call_operand.hbm [shape: f32[8,32], index: 4, kind: output, shape index: {}]  }
   0x1   :  { %10 = vsyncpa [#allocation4], 0  ;;  %s601_s15 = smov [#allocation2]   ;;  %s553_s19 = scalar_lea.hbm %s747_s0, 512 }
   0x2   :  { %s16_s16 = sshll.u32 %s601_s15, 4  ;;  %p554_p0 = scmp.ne.s32.totalorder %s747_s0, %s553_s19  ;;  %s17_s16 = int_to_ptr.vmem [resolvable:$true] %s16_s16 }
   0x3   :  { %p557_p1 = scmp.lt.u32.totalorder %s553_s19, %s747_s0 }
   0x5   :  { %p559_p2 = pnand %p557_p1, %p554_p0 }
   0x7   :  { %562 = shalt.err (!%p559_p2)
}
   0x8   :  { %s563_s24 = scalar_lea.vmem %s17_s16, 512  ;;  %p568_p4 = scmp.lt.s32.totalorder %s17_s16, %s17_s16 }
   0x9   :  { %p564_p3 = scmp.ne.s32.totalorder %s17_s16, %s563_s24  ;;  %p569_p5 = scmp.lt.s32.totalorder %s563_s24, %s563_s24 }
   0xb   :  { %p570_p6 = por %p569_p5, %p568_p4 }
   0xd   :  { %p571_p7 = pnand %p570_p6, %p564_p3 }
   0xf   :  { %574 = shalt.err (!%p571_p7)
}
  0x10   :  { %s602_s25 = smov 64   ;;  %s603_s26 = smov 4  }
  0x11   :  { %22 = dma.hbm_to_vmem [thread:$0]  %s747_s0, 512, %s17_s16, [#allocation3], %s602_s25, %s602_s25, %s603_s26  }
  0x12   :  { %597 = dma.done.wait [#allocation3], 512  }
  0x13   :  { %598 = vsyncadd [#allocation3], 4294966784  ;;  %v495_v0 = vld [vmem:[%s748_s1] sm:$0xff]   ;;  %v496_v1 = vld [vmem:[%s748_s1 + $0x8] sm:$0xff]   ;;  %vm85_vm0 = vcmask 261120   ;;  %vm185_vm1 = vcmask 130048  }
  0x14   :  { %475 = vmatprep.subr.bf16.mxu0 %v495_v0  ;;  %487 = vmatprep.subr.bf16.mxu1 %v495_v0  ;;  %v648_v2 = vld [vmem:[#allocation2] sm:$0xff]   ;;  %v650_v3 = vld [vmem:[#allocation2 + $0x10] sm:$0xff]   ;;  %v652_v4 = vld [vmem:[#allocation2 + $0x8] sm:$0xff]   ;;  %vm426_vm2 = vcmask 1041409   ;;  %vm428_vm3 = vcmask 1042434   ;;  %vm430_vm4 = vcmask 1043459  }
  0x15   :  { %476 = vmatpush3.bf16.msra.mxu0 %v495_v0  ;;  %489 = vmatpush3.bf16.msra.mxu1 %v495_v0  ;;  %v654_v5 = vld [vmem:[#allocation2 + $0x18] sm:$0xff]   ;;  %v457_v6 = vld [vmem:[%s749_s2] ss:$0 sm:$0xff]  ;;  %vm432_vm5 = vcmask 1044484   ;;  %vm434_vm6 = vcmask 1045509   ;;  %vm436_vm7 = vcmask 1046534  }
  0x16   :  { %477 = vmatprep.subr.bf16.mxu0 %v496_v1  ;;  %488 = vmatprep.subr.bf16.mxu1 %v496_v1  ;;  %v468_v23 = vld [vmem:[%s750_s3] ss:$0 sm:$0xff]  ;;  %s604_s3 = smov [#allocation5]   ;;  %vm438_vm8 = vcmask 1047559  }
  0x17   :  { %479 = vmatprep.mubr.msk.bf16.mxu0 %vm85_vm0, %v648_v2  ;;  %483 = vmatprep.mubr.msk.bf16.mxu1 %vm85_vm0, %v650_v3  ;;  %s448_s8 = sshll.u32 %s604_s3, 4  ;;  %s449_s8 = int_to_ptr.vmem [resolvable:$true] %s448_s8 }
  0x18   :  { %s575_s9 = scalar_lea.vmem %s449_s8, 128  ;;  %p580_p9 = scmp.lt.s32.totalorder %s449_s8, %s449_s8 }
  0x19   :  { %478 = vmatpush3.bf16.msra.mxu0 %v496_v1  ;;  %490 = vmatpush3.bf16.msra.mxu1 %v496_v1  ;;  %p576_p8 = scmp.ne.s32.totalorder %s449_s8, %s575_s9  ;;  %p581_p10 = scmp.lt.s32.totalorder %s575_s9, %s575_s9 }
  0x1b   :  { %p582_p11 = por %p581_p10, %p580_p9 }
  0x1c   :  { %480 = vmatmul.mubr.msk.bf16.vlgmr.msra.gmra.mrb[0].mxu0 %vm85_vm0, %v652_v4  ;;  %484 = vmatmul.mubr.msk.bf16.vlgmr.msra.gmra.mrb[0].mxu1 %vm85_vm0, %v654_v5 }
  0x1d   :  { %p583_p12 = pnand %p582_p11, %p576_p8 }
  0xef   :  { %v481_v7 = vpop.f32.mrb[0].mxu0  ;;  %v485_v8 = vpop.f32.mrb[0].mxu1 }
  0xf0   :  { %v141_v9 = vadd.f32 %v481_v7, %v457_v6  ;;  %v132_v10 = vpop.f32.mrb[1].mxu0  ;;  %v148_v11 = vpop.f32.mrb[1].mxu1  ;;  %v157_v22 = vadd.f32 %v485_v8, %v457_v6 }
  0xf1   :  { %v133_v12 = vadd.f32 %v457_v6, %v132_v10  ;;  %v482_v13 = vpop.f32.mrb[2].mxu0  ;;  %v486_v14 = vpop.f32.mrb[2].mxu1  ;;  %v149_v19 = vadd.f32 %v457_v6, %v148_v11 }
  0xf2   :  { %505 = vtanh.f32 %v141_v9  ;;  %v144_v15 = vadd.f32 %v482_v13, %v457_v6  ;;  %v135_v16 = vpop.f32.mrb[3].mxu0  ;;  %v151_v17 = vpop.f32.mrb[3].mxu1  ;;  %v160_v21 = vadd.f32 %v486_v14, %v457_v6 }
  0xf3   :  { %507 = vtanh.f32 %v133_v12  ;;  %v136_v18 = vadd.f32 %v457_v6, %v135_v16  ;;  %v152_v20 = vadd.f32 %v457_v6, %v151_v17 }
  0xf4   :  { %509 = vtanh.f32 %v144_v15 }
  0xf5   :  { %511 = vtanh.f32 %v136_v18 }
  0xf6   :  { %513 = vtanh.f32 %v149_v19 }
  0xf7   :  { %515 = vtanh.f32 %v152_v20 }
  0xf8   :  { %517 = vtanh.f32 %v160_v21 }
  0xf9   :  { %519 = vtanh.f32 %v157_v22 }
  0xfc   :  { %v506_v24 = vpop.eup %505 }
  0xfd   :  { %v508_v25 = vpop.eup %507  ;;  %v179_v26 = vmul.f32 %v506_v24, %v468_v23 }
  0xfe   :  { %v510_v27 = vpop.eup %509  ;;  %v177_v28 = vmul.f32 %v508_v25, %v468_v23 }
  0xff   :  { %v512_v29 = vpop.eup %511  ;;  %v192_v30 = vsel %vm185_vm1, %v179_v26, 0.0  ;;  %v180_v31 = vmul.f32 %v510_v27, %v468_v23 }
 0x100   :  { %193 = vadd.xlane.f32.xlu1 %v192_v30  ;;  %v186_v32 = vsel %vm185_vm1, %v177_v28, 0.0  ;;  %v178_v33 = vmul.f32 %v512_v29, %v468_v23  ;;  %v514_v34 = vpop.eup %513 }
 0x101   :  { %187 = vadd.xlane.f32.xlu0 %v186_v32  ;;  %v516_v35 = vpop.eup %515  ;;  %v195_v36 = vsel %vm185_vm1, %v180_v31, 0.0  ;;  %v181_v40 = vmul.f32 %v514_v34, %v468_v23 }
 0x102   :  { %v518_v37 = vpop.eup %517  ;;  %v189_v38 = vsel %vm185_vm1, %v178_v33, 0.0  ;;  %v182_v39 = vmul.f32 %v516_v35, %v468_v23 }
 0x103   :  { %v520_v41 = vpop.eup %519  ;;  %v184_v43 = vmul.f32 %v518_v37, %v468_v23  ;;  %v198_v44 = vsel %vm185_vm1, %v181_v40, 0.0 }
 0x104   :  { %196 = vadd.xlane.f32.xlu1 %v195_v36  ;;  %v201_v42 = vsel %vm185_vm1, %v182_v39, 0.0  ;;  %v183_v45 = vmul.f32 %v520_v41, %v468_v23 }
 0x105   :  { %190 = vadd.xlane.f32.xlu0 %v189_v38  ;;  %v207_v46 = vsel %vm185_vm1, %v184_v43, 0.0 }
 0x106   :  { %v204_v47 = vsel %vm185_vm1, %v183_v45, 0.0 }
 0x108   :  { %202 = vadd.xlane.f32.xlu1 %v201_v42 }
 0x109   :  { %199 = vadd.xlane.f32.xlu0 %v198_v44 }
 0x10c   :  { %208 = vadd.xlane.f32.xlu1 %v207_v46 }
 0x10d   :  { %205 = vadd.xlane.f32.xlu0 %v204_v47 }
 0x18d   :  { %v194_v48 = vpop.xlane.xlu1 %193 }
 0x18e   :  { %v222_v49 = vrot.slane %v194_v48, 4  ;;  %v188_v50 = vpop.xlane.xlu0 %187 }
 0x18f   :  { %v210_v51 = vrot.slane %v188_v50, 4 }
 0x190   :  { %v223_v52 = vmax.f32 %v194_v48, %v222_v49 }
 0x191   :  { %v211_v53 = vmax.f32 %v188_v50, %v210_v51  ;;  %v197_v54 = vpop.xlane.xlu1 %196 }
 0x192   :  { %v224_v55 = vrot.slane %v223_v52, 2  ;;  %v228_v56 = vrot.slane %v197_v54, 4  ;;  %v191_v57 = vpop.xlane.xlu0 %190 }
 0x193   :  { %v212_v58 = vrot.slane %v211_v53, 2  ;;  %v216_v59 = vrot.slane %v191_v57, 4 }
 0x194   :  { %v225_v60 = vmax.f32 %v223_v52, %v224_v55  ;;  %v229_v61 = vmax.f32 %v197_v54, %v228_v56 }
 0x195   :  { %v213_v62 = vmax.f32 %v211_v53, %v212_v58  ;;  %v217_v63 = vmax.f32 %v191_v57, %v216_v59  ;;  %v203_v0 = vpop.xlane.xlu1 %202 }
 0x196   :  { %v226_v1 = vrot.slane %v225_v60, 1  ;;  %v230_v6 = vrot.slane %v229_v61, 2  ;;  %v240_v7 = vrot.slane %v203_v0, 4  ;;  %v200_v8 = vpop.xlane.xlu0 %199 }
 0x197   :  { %v214_v9 = vrot.slane %v213_v62, 1  ;;  %v218_v10 = vrot.slane %v217_v63, 2  ;;  %v234_v11 = vrot.slane %v200_v8, 4 }
 0x198   :  { %v227_v12 = vmax.f32 %v225_v60, %v226_v1  ;;  %v231_v13 = vmax.f32 %v229_v61, %v230_v6  ;;  %v241_v14 = vmax.f32 %v203_v0, %v240_v7 }
 0x199   :  { %v215_v15 = vmax.f32 %v213_v62, %v214_v9  ;;  %v219_v16 = vmax.f32 %v217_v63, %v218_v10  ;;  %v235_v17 = vmax.f32 %v200_v8, %v234_v11  ;;  %v209_v18 = vpop.xlane.xlu1 %208 }
 0x19a   :  { %v260_v19 = vsub.f32 %v194_v48, %v227_v12  ;;  %v232_v20 = vrot.slane %v231_v13, 1  ;;  %v242_v21 = vrot.slane %v241_v14, 2  ;;  %v252_v22 = vrot.slane %v209_v18, 4  ;;  %v206_v23 = vpop.xlane.xlu0 %205 }
 0x19b   :  { %v258_v24 = vsub.f32 %v188_v50, %v215_v15  ;;  %v220_v25 = vrot.slane %v219_v16, 1  ;;  %v236_v26 = vrot.slane %v235_v17, 2  ;;  %v246_v27 = vrot.slane %v206_v23, 4 }
 0x19c   :  { %v270_v28 = vmul.f32 1.442695, %v260_v19  ;;  %v233_v29 = vmax.f32 %v231_v13, %v232_v20  ;;  %v243_v30 = vmax.f32 %v241_v14, %v242_v21  ;;  %v253_v31 = vmax.f32 %v209_v18, %v252_v22 }
 0x19d   :  { %v266_v32 = vmul.f32 1.442695, %v258_v24  ;;  %v221_v33 = vmax.f32 %v219_v16, %v220_v25  ;;  %v237_v34 = vmax.f32 %v235_v17, %v236_v26  ;;  %v247_v35 = vmax.f32 %v206_v23, %v246_v27 }
 0x19e   :  { %521 = vpow2.f32 %v270_v28  ;;  %v261_v36 = vsub.f32 %v197_v54, %v233_v29  ;;  %v244_v37 = vrot.slane %v243_v30, 1  ;;  %v254_v38 = vrot.slane %v253_v31, 2 }
 0x19f   :  { %523 = vpow2.f32 %v266_v32  ;;  %v259_v39 = vsub.f32 %v191_v57, %v221_v33  ;;  %v238_v40 = vrot.slane %v237_v34, 1  ;;  %v248_v41 = vrot.slane %v247_v35, 2 }
 0x1a0   :  { %v272_v42 = vmul.f32 1.442695, %v261_v36  ;;  %v245_v43 = vmax.f32 %v243_v30, %v244_v37  ;;  %v255_v44 = vmax.f32 %v253_v31, %v254_v38 }
 0x1a1   :  { %v268_v45 = vmul.f32 1.442695, %v259_v39  ;;  %v239_v46 = vmax.f32 %v237_v34, %v238_v40  ;;  %v249_v47 = vmax.f32 %v247_v35, %v248_v41 }
 0x1a2   :  { %525 = vpow2.f32 %v272_v42  ;;  %v263_v48 = vsub.f32 %v203_v0, %v245_v43  ;;  %v256_v49 = vrot.slane %v255_v44, 1 }
 0x1a3   :  { %527 = vpow2.f32 %v268_v45  ;;  %v262_v50 = vsub.f32 %v200_v8, %v239_v46  ;;  %v250_v51 = vrot.slane %v249_v47, 1 }
 0x1a4   :  { %v276_v52 = vmul.f32 1.442695, %v263_v48  ;;  %v257_v53 = vmax.f32 %v255_v44, %v256_v49 }
 0x1a5   :  { %v274_v54 = vmul.f32 1.442695, %v262_v50  ;;  %v251_v55 = vmax.f32 %v249_v47, %v250_v51 }
 0x1a6   :  { %529 = vpow2.f32 %v276_v52  ;;  %v265_v56 = vsub.f32 %v209_v18, %v257_v53  ;;  %v348_v53 = vunpack.c.l.bf16 %v652_v4 }
 0x1a7   :  { %531 = vpow2.f32 %v274_v54  ;;  %v264_v57 = vsub.f32 %v206_v23, %v251_v55 }
 0x1a8   :  { %v678_v58 = vpop.eup %521  ;;  %v280_v59 = vmul.f32 1.442695, %v265_v56  ;;  %v346_v56 = vunpack.c.l.bf16 %v648_v2 }
 0x1a9   :  { %v680_v60 = vpop.eup %523  ;;  %v294_v61 = vrot.slane %v678_v58, 4  ;;  %v278_v62 = vmul.f32 1.442695, %v264_v57 }
 0x1aa   :  { %v282_v63 = vrot.slane %v680_v60, 4  ;;  %533 = vpow2.f32 %v280_v59 }
 0x1ab   :  { %v295_v0 = vadd.f32 %v678_v58, %v294_v61  ;;  %535 = vpow2.f32 %v278_v62 }
 0x1ac   :  { %v685_v1 = vpop.eup %525  ;;  %v283_v6 = vadd.f32 %v680_v60, %v282_v63 }
 0x1ad   :  { %v688_v7 = vpop.eup %527  ;;  %v296_v8 = vrot.slane %v295_v0, 2  ;;  %v300_v9 = vrot.slane %v685_v1, 4 }
 0x1ae   :  { %v284_v10 = vrot.slane %v283_v6, 2  ;;  %v288_v11 = vrot.slane %v688_v7, 4 }
 0x1af   :  { %v297_v12 = vadd.f32 %v296_v8, %v295_v0  ;;  %v301_v13 = vadd.f32 %v685_v1, %v300_v9  ;;  %v349_v0 = vunpack.c.h.bf16 %v652_v4  ;;  %v347_v9 = vunpack.c.h.bf16 %v648_v2 }
 0x1b0   :  { %v693_v14 = vpop.eup %529  ;;  %v285_v15 = vadd.f32 %v284_v10, %v283_v6  ;;  %v289_v16 = vadd.f32 %v688_v7, %v288_v11 }
 0x1b1   :  { %v696_v17 = vpop.eup %531  ;;  %v298_v18 = vrot.slane %v297_v12, 1  ;;  %v302_v19 = vrot.slane %v301_v13, 2  ;;  %v312_v20 = vrot.slane %v693_v14, 4 }
 0x1b2   :  { %v286_v21 = vrot.slane %v285_v15, 1  ;;  %v290_v22 = vrot.slane %v289_v16, 2  ;;  %v306_v23 = vrot.slane %v696_v17, 4 }
 0x1b3   :  { %v299_v24 = vadd.f32 %v298_v18, %v297_v12  ;;  %v303_v25 = vadd.f32 %v302_v19, %v301_v13  ;;  %v313_v26 = vadd.f32 %v693_v14, %v312_v20  ;;  %v350_v20 = vunpack.c.l.bf16 %v650_v3 }
 0x1b4   :  { %v701_v27 = vpop.eup %533  ;;  %v287_v28 = vadd.f32 %v286_v21, %v285_v15  ;;  %v291_v29 = vadd.f32 %v290_v22, %v289_v16  ;;  %v307_v30 = vadd.f32 %v696_v17, %v306_v23 }
 0x1b5   :  { %v704_v31 = vpop.eup %535  ;;  %537 = vrcp.f32 %v299_v24  ;;  %v304_v32 = vrot.slane %v303_v25, 1  ;;  %v314_v33 = vrot.slane %v313_v26, 2  ;;  %v324_v34 = vrot.slane %v701_v27, 4 }
 0x1b6   :  { %539 = vrcp.f32 %v287_v28  ;;  %v292_v35 = vrot.slane %v291_v29, 1  ;;  %v308_v36 = vrot.slane %v307_v30, 2  ;;  %v318_v37 = vrot.slane %v704_v31, 4 }
 0x1b7   :  { %v305_v38 = vadd.f32 %v304_v32, %v303_v25  ;;  %v315_v39 = vadd.f32 %v314_v33, %v313_v26  ;;  %v325_v40 = vadd.f32 %v701_v27, %v324_v34  ;;  %v352_v34 = vunpack.c.l.bf16 %v654_v5 }
 0x1b8   :  { %v293_v41 = vadd.f32 %v292_v35, %v291_v29  ;;  %v309_v42 = vadd.f32 %v308_v36, %v307_v30  ;;  %v319_v43 = vadd.f32 %v704_v31, %v318_v37  ;;  %v353_v29 = vunpack.c.h.bf16 %v654_v5 }
 0x1b9   :  { %541 = vrcp.f32 %v305_v38  ;;  %v316_v44 = vrot.slane %v315_v39, 1  ;;  %v326_v45 = vrot.slane %v325_v40, 2 }
 0x1ba   :  { %543 = vrcp.f32 %v293_v41  ;;  %v310_v46 = vrot.slane %v309_v42, 1  ;;  %v320_v47 = vrot.slane %v319_v43, 2 }
 0x1bb   :  { %v317_v48 = vadd.f32 %v316_v44, %v315_v39  ;;  %v327_v49 = vadd.f32 %v326_v45, %v325_v40 }
 0x1bc   :  { %v311_v50 = vadd.f32 %v310_v46, %v309_v42  ;;  %v321_v51 = vadd.f32 %v320_v47, %v319_v43 }
 0x1bd   :  { %v328_v52 = vrot.slane %v327_v49, 1  ;;  %545 = vrcp.f32 %v317_v48 }
 0x1be   :  { %547 = vrcp.f32 %v311_v50  ;;  %v322_v54 = vrot.slane %v321_v51, 1 }
 0x1bf   :  { %v538_v55 = vpop.eup %537  ;;  %v329_v57 = vadd.f32 %v328_v52, %v327_v49 }
 0x1c0   :  { %v540_v59 = vpop.eup %539  ;;  %v323_v61 = vadd.f32 %v322_v54, %v321_v51  ;;  %v340_v62 = vmul.f32 %v538_v55, %v678_v58 }
 0x1c1   :  { %v338_v63 = vmul.f32 %v540_v59, %v680_v60  ;;  %549 = vrcp.f32 %v329_v57  ;;  %v351_v60 = vunpack.c.h.bf16 %v650_v3 }
 0x1c2   :  { %551 = vrcp.f32 %v323_v61  ;;  %v356_v6 = vmul.f32 %v348_v53, %v340_v62 }
 0x1c3   :  { %v542_v8 = vpop.eup %541  ;;  %v354_v10 = vmul.f32 %v346_v56, %v338_v63 }
 0x1c4   :  { %v544_v11 = vpop.eup %543  ;;  %v341_v12 = vmul.f32 %v542_v8, %v685_v1  ;;  %v376_v13 = vsel %vm85_vm0, %v356_v6, 0.0 }
 0x1c5   :  { %v339_v15 = vmul.f32 %v544_v11, %v688_v7  ;;  %v362_v58 = vsel %vm85_vm0, %v354_v10, 0.0  ;;  %v377_v16 = vrot.slane %v376_v13, 4 }
 0x1c6   :  { %v357_v18 = vmul.f32 %v349_v0, %v341_v12  ;;  %v363_v4 = vrot.slane %v362_v58, 4 }
 0x1c7   :  { %v546_v19 = vpop.eup %545  ;;  %v355_v21 = vmul.f32 %v347_v9, %v339_v15  ;;  %v378_v2 = vadd.f32 %v377_v16, %v376_v13 }
 0x1c8   :  { %v548_v22 = vpop.eup %547  ;;  %v343_v23 = vmul.f32 %v546_v19, %v693_v14  ;;  %v364_v1 = vadd.f32 %v363_v4, %v362_v58  ;;  %v383_v24 = vsel %vm85_vm0, %v357_v18, 0.0 }
 0x1c9   :  { %v342_v7 = vmul.f32 %v548_v22, %v696_v17  ;;  %v369_v25 = vsel %vm85_vm0, %v355_v21, 0.0  ;;  %v379_v26 = vrot.slane %v378_v2, 2  ;;  %v384_v28 = vrot.slane %v383_v24, 4 }
 0x1ca   :  { %v359_v30 = vmul.f32 %v351_v60, %v343_v23  ;;  %v365_v32 = vrot.slane %v364_v1, 2  ;;  %v370_v33 = vrot.slane %v369_v25, 4 }
 0x1cb   :  { %v550_v3 = vpop.eup %549  ;;  %v358_v35 = vmul.f32 %v350_v20, %v342_v7  ;;  %v385_v36 = vadd.f32 %v384_v28, %v383_v24  ;;  %v380_v41 = vadd.f32 %v379_v26, %v378_v2 }
 0x1cc   :  { %v552_v14 = vpop.eup %551  ;;  %v345_v37 = vmul.f32 %v550_v3, %v701_v27  ;;  %v366_v38 = vadd.f32 %v365_v32, %v364_v1  ;;  %v371_v39 = vadd.f32 %v370_v33, %v369_v25  ;;  %v397_v17 = vsel %vm85_vm0, %v359_v30, 0.0 }
 0x1cd   :  { %v344_v40 = vmul.f32 %v552_v14, %v704_v31  ;;  %v386_v42 = vrot.slane %v385_v36, 2  ;;  %v390_v43 = vsel %vm85_vm0, %v358_v35, 0.0  ;;  %v398_v48 = vrot.slane %v397_v17, 4 }
 0x1ce   :  { %v361_v44 = vmul.f32 %v353_v29, %v345_v37  ;;  %v372_v45 = vrot.slane %v371_v39, 2  ;;  %v391_v46 = vrot.slane %v390_v43, 4  ;;  %v367_v49 = vrot.slane %v366_v38, 1 }
 0x1cf   :  { %v360_v47 = vmul.f32 %v352_v34, %v344_v40  ;;  %v387_v5 = vadd.f32 %v386_v42, %v385_v36  ;;  %v381_v52 = vrot.slane %v380_v41, 1  ;;  %v399_v53 = vadd.f32 %v398_v48, %v397_v17 }
 0x1d0   :  { %v373_v50 = vadd.f32 %v372_v45, %v371_v39  ;;  %v392_v51 = vadd.f32 %v391_v46, %v390_v43  ;;  %v411_v27 = vsel %vm85_vm0, %v361_v44, 0.0  ;;  %v368_v63 = vadd.f32 %v367_v49, %v366_v38 }
 0x1d1   :  { %v404_v54 = vsel %vm85_vm0, %v360_v47, 0.0  ;;  %v412_v31 = vrot.slane %v411_v27, 4  ;;  %v388_v56 = vrot.slane %v387_v5, 1  ;;  %v400_v61 = vrot.slane %v399_v53, 2 }
 0x1d2   :  { %v374_v55 = vrot.slane %v373_v50, 1  ;;  %v393_v57 = vrot.slane %v392_v51, 2  ;;  %v405_v59 = vrot.slane %v404_v54, 4  ;;  %v382_v9 = vadd.f32 %v381_v52, %v380_v41 }
 0x1d3   :  { %v413_v62 = vadd.f32 %v412_v31, %v411_v27  ;;  %v401_v10 = vadd.f32 %v400_v61, %v399_v53  ;;  %v389_v12 = vadd.f32 %v388_v56, %v387_v5 }
 0x1d4   :  { %v375_v0 = vadd.f32 %v374_v55, %v373_v50  ;;  %v394_v6 = vadd.f32 %v393_v57, %v392_v51  ;;  %v406_v8 = vadd.f32 %v405_v59, %v404_v54 }
 0x1d5   :  { %v414_v11 = vrot.slane %v413_v62, 2  ;;  %v402_v16 = vrot.slane %v401_v10, 1 }
 0x1d6   :  { %v395_v13 = vrot.slane %v394_v6, 1  ;;  %v407_v15 = vrot.slane %v406_v8, 2  ;;  %v427_v58 = vsel %vm426_vm2, %v375_v0, %v368_v63 }
 0x1d7   :  { %v415_v60 = vadd.f32 %v414_v11, %v413_v62  ;;  %v429_v18 = vsel %vm428_vm3, %v382_v9, %v427_v58  ;;  %v403_v21 = vadd.f32 %v402_v16, %v401_v10 }
 0x1d8   :  { %v396_v4 = vadd.f32 %v395_v13, %v394_v6  ;;  %v408_v19 = vadd.f32 %v407_v15, %v406_v8  ;;  %v431_v20 = vsel %vm430_vm4, %v389_v12, %v429_v18 }
 0x1d9   :  { %v416_v2 = vrot.slane %v415_v60, 1 }
 0x1da   :  { %v409_v22 = vrot.slane %v408_v19, 1  ;;  %v433_v23 = vsel %vm432_vm5, %v396_v4, %v431_v20 }
 0x1db   :  { %v435_v1 = vsel %vm434_vm6, %v403_v21, %v433_v23  ;;  %v417_v7 = vadd.f32 %v416_v2, %v415_v60 }
 0x1dc   :  { %v410_v24 = vadd.f32 %v409_v22, %v408_v19 }
 0x1de   :  { %v437_v25 = vsel %vm436_vm7, %v410_v24, %v435_v1 }
 0x1df   :  { %v439_v26 = vsel %vm438_vm8, %v417_v7, %v437_v25 }
 0x1e0   :  { %441 = vst.msk [vmem:[#allocation5] sm:$0xff] %vm85_vm0, %v439_v26 }
 0x1e1   :  { %586 = shalt.err (!%p583_p12)
}
 0x1e2   :  { %s587_s12 = scalar_lea.hbm %s751_s4, 128 }
 0x1e3   :  { %p588_p13 = scmp.ne.s32.totalorder %s751_s4, %s587_s12  ;;  %p591_p0 = scmp.lt.u32.totalorder %s587_s12, %s751_s4 }
 0x1e5   :  { %p593_p1 = pnand %p591_p0, %p588_p13 }
 0x1e7   :  { %596 = shalt.err (!%p593_p1)
}
 0x1e8   :  { %451 = dma.vmem_to_hbm [thread:$0]  %s449_s8, 128, %s751_s4, [#allocation4]  }
 0x1e9   :  { %599 = dma.done.wait [#allocation4], 128  }
 0x1ea   :  { %600 = vsyncadd [#allocation4], 4294967168 }
 0x1eb   :  { %455 = vsyncpa [#allocation3], 1 }
 0x1ec   :  { %456 = vsyncpa [#allocation4], 1 }

</bundles_post_ra>
